<compile_context>
chip_gen: v7x
topology: tpu7x:2x2x1
jax: 0.10.0
libtpu: 0.0.40
codegen_flags: <defaults>
</compile_context>

<pallas_src>
import jax
import jax.numpy as jnp
from jax import lax
from jax.experimental import pallas as pl
from jax.experimental.pallas import tpu as pltpu


def _make_ar_kernel(n_out: int):
    """Build the AR linear kernel specialized for a static out_features."""

    def ar_kernel(x_ref, w_ref, o_ref):
        # x_ref: (B, K)   f32 in VMEM
        # w_ref: (N, K)   f32 in VMEM (native nn.Linear layout, no transpose)
        # o_ref: (B, N)
        x = x_ref[...]

        if n_out <= 8:
            # Tiny N (module default N=1): stay entirely on the VPU (elementwise
            # multiply) + XLU (cross-lane reduce); no MXU push/pop on the
            # critical path of this latency-bound kernel.
            cols = []
            for j in range(n_out):
                w_row = w_ref[j:j + 1, :]                      # (1, K), static slice
                cols.append(jnp.sum(x * w_row, axis=-1, keepdims=True))  # (B, 1)
            y = cols[0] if n_out == 1 else jnp.concatenate(cols, axis=-1)
        else:
            # Scaled-up fallback: contract x (B,K) with w (N,K) on the MXU,
            # contracting dim 1 of both (still no transpose needed).
            y = lax.dot_general(
                x, w_ref[...],
                dimension_numbers=(((1,), (1,)), ((), ())),
                preferred_element_type=jnp.float32,
            )

        o_ref[...] = y.astype(o_ref.dtype)

    return ar_kernel


def ar_forward(x, weight):
    """AR forward: out = x @ weight.T, weight given as (out_features, in_features)."""
    B, in_features = x.shape
    out_features, in_features_w = weight.shape
    assert in_features == in_features_w

    # Whole arrays fit comfortably in VMEM at AR(p) scales -> single invocation,
    # no grid, everything resident in VMEM.
    return pl.pallas_call(
        _make_ar_kernel(out_features),
        out_shape=jax.ShapeDtypeStruct((B, out_features), x.dtype),
        in_specs=[
            pl.BlockSpec(memory_space=pltpu.MemorySpace.VMEM),
            pl.BlockSpec(memory_space=pltpu.MemorySpace.VMEM),
        ],
        out_specs=pl.BlockSpec(memory_space=pltpu.MemorySpace.VMEM),
    )(x, weight)


if __name__ == "__main__":
    # Small shapes consistent with AR(p): memory (in_features) = 32, batch = 8.
    batch = 8
    in_features = 32   # AR "memory" p
    out_features = 1   # module default
    # bias=False is the module default; a bias would just be a broadcast add
    # of a (1, out_features) row inside the kernel.

    key = jax.random.PRNGKey(0)
    k_x, k_w = jax.random.split(key)

    x = jax.random.normal(k_x, (batch, in_features), dtype=jnp.float32)
    # nn.init.normal_(weight, std=0.001), native (out_features, in_features) layout.
    weight = 0.001 * jax.random.normal(
        k_w, (out_features, in_features), dtype=jnp.float32
    )

    out = jax.block_until_ready(ar_forward(x, weight))

    # Correctness check against the plain-JAX reference of nn.Linear (no bias).
    ref = x @ weight.T
    assert out.shape == (batch, out_features)
    assert jnp.allclose(out, ref, atol=1e-6, rtol=1e-5)

    print("KERNEL_OK")
</pallas_src>

<mosaic_0001>
module attributes {stable_mosaic.version = 11 : i64} {
  func.func @ar_kernel(%arg0: memref<8x32xf32, #tpu.memory_space<vmem>>, %arg1: memref<1x32xf32, #tpu.memory_space<vmem>>, %arg2: memref<8x1xf32, #tpu.memory_space<vmem>>) attributes {dimension_semantics = [], scalar_prefetch = 0 : i64, scratch_operands = 0 : i64, tpu.core_type = #tpu.core_type<tc>} {
    %c0 = arith.constant 0 : index
    %c0_0 = arith.constant 0 : index
    %0 = vector.load %arg0[%c0, %c0_0] : memref<8x32xf32, #tpu.memory_space<vmem>>, vector<8x32xf32>
    %c0_1 = arith.constant 0 : index
    %c0_2 = arith.constant 0 : index
    %1 = vector.load %arg1[%c0_1, %c0_2] : memref<1x32xf32, #tpu.memory_space<vmem>>, vector<1x32xf32>
    %2 = vector.broadcast %1 : vector<1x32xf32> to vector<8x32xf32>
    %3 = arith.mulf %0, %2 : vector<8x32xf32>
    %cst = arith.constant dense<0.000000e+00> : vector<8xf32>
    %4 = vector.multi_reduction <add>, %3, %cst [1] : vector<8x32xf32> to vector<8xf32>
    %5 = vector.shape_cast %4 : vector<8xf32> to vector<8x1xf32>
    %c0_3 = arith.constant 0 : index
    %c0_4 = arith.constant 0 : index
    %6 = vector.load %arg2[%c0_3, %c0_4] : memref<8x1xf32, #tpu.memory_space<vmem>>, vector<8x1xf32>
    tpu.vector_store %arg2[%c0_3, %c0_4], %5 {strides = array<i32>} : memref<8x1xf32, #tpu.memory_space<vmem>>, vector<8x1xf32>,
    return
  }
}

</mosaic_0001>

<bundles_post_ra>
// kernel: tpu_custom_call.1
= control target key start
LH: loop header
LB: loop body
LE: loop exit
PB: predicated region body
PF: predicated region fallthrough
CT: control target
= control target key end

     0   :  { %7 = vsyncpa [#allocation3], 0  ;;  %s69_s9 = smov [#allocation2]   ;;  %s103_s0 = inlined_call_operand.hbm [shape: f32[8,32], index: 0, kind: input, shape index: {}]   ;;  %s104_s1 = inlined_call_operand.vmem [shape: f32[1,32], index: 1, kind: input, shape index: {}]   ;;  %s105_s2 = inlined_call_operand.vmem [shape: f32[8,1], index: 2, kind: output, shape index: {}]  }
   0x1   :  { %s14_s10 = sshll.u32 %s69_s9, 4  ;;  %s45_s13 = scalar_lea.hbm %s103_s0, 128  ;;  %s15_s10 = int_to_ptr.vmem [resolvable:$true] %s14_s10 }
   0x2   :  { %p46_p0 = scmp.ne.s32.totalorder %s103_s0, %s45_s13  ;;  %p49_p1 = scmp.lt.u32.totalorder %s45_s13, %s103_s0 }
   0x4   :  { %p51_p2 = pnand %p49_p1, %p46_p0 }
   0x6   :  { %54 = shalt.err (!%p51_p2)
}
   0x7   :  { %s55_s18 = scalar_lea.vmem %s15_s10, 128  ;;  %p60_p4 = scmp.lt.s32.totalorder %s15_s10, %s15_s10 }
   0x8   :  { %p56_p3 = scmp.ne.s32.totalorder %s15_s10, %s55_s18  ;;  %p61_p5 = scmp.lt.s32.totalorder %s55_s18, %s55_s18 }
   0xa   :  { %p62_p6 = por %p61_p5, %p60_p4 }
   0xc   :  { %p63_p7 = pnand %p62_p6, %p56_p3 }
   0xe   :  { %66 = shalt.err (!%p63_p7)
}
   0xf   :  { %17 = dma.hbm_to_vmem [thread:$0]  %s103_s0, 128, %s15_s10, [#allocation3]  }
  0x10   :  { %67 = dma.done.wait [#allocation3], 128  }
  0x11   :  { %68 = vsyncadd [#allocation3], 4294967168  ;;  %v23_v0 = vld [vmem:[#allocation2] sm:$0xff]  ;;  %vm32_vm0 = vcmask 261120   ;;  %vm36_vm1 = vcmask 7168  }
  0x12   :  { %v43_v1 = vld [vmem:[%s104_s1] ss:$0 sm:$0xff] }
  0x13   :  { %v31_v2 = vmul.f32 %v43_v1, %v23_v0 }
  0x15   :  { %v33_v3 = vsel %vm32_vm0, %v31_v2, 0.0 }
  0x16   :  { %34 = vadd.xlane.f32.xlu0 %v33_v3 }
  0xa3   :  { %v35_v4 = vpop.xlane.xlu0 %34 }
  0xa4   :  { %37 = vst.msk [vmem:[%s105_s2] sm:$0xff] %vm36_vm1, %v35_v4 }
  0xa5   :  { %42 = vsyncpa [#allocation3], 1 }

</bundles_post_ra>
